<compile_context>
chip_gen: v6e
topology: v6e:2x2x1
jax: 0.10.0
libtpu: 0.0.40
codegen_flags: <defaults>
</compile_context>

<pallas_src>
import jax
import jax.numpy as jnp
from jax.experimental import pallas as pl
from jax.experimental.pallas import tpu as pltpu


def _round_up(x, m):
    return (x + m - 1) // m * m


def _cdiv(a, b):
    return (a + b - 1) // b


def _linear_kernel(x_ref, wt_ref, b_ref, o_ref):
    # x_ref: (TM, K_pad) native dtype; wt_ref: (K_pad, N_pad) f32/bf16;
    # b_ref: (1, N_pad) f32; o_ref: (TM, N_pad) f32.
    # Cast the activation tile in-register (no wrapper-side astype HBM pass),
    # accumulate in f32 on the MXU, add bias in f32.
    x = x_ref[...].astype(wt_ref.dtype)
    acc = jnp.dot(x, wt_ref[...], preferred_element_type=jnp.float32)
    o_ref[...] = (acc + b_ref[...]).astype(o_ref.dtype)


def prepare_params(weight, bias, compute_dtype=jnp.float32):
    """One-time parameter prep (hoisted out of the per-call forward).

    Transposes W to (input_dim, output_dim), pads BOTH the contraction axis
    and the output axis up to 128-lane multiples so MXU contractions are
    full-width and stores are lane-dense (unmasked vst).  Bias stays f32
    regardless of compute_dtype (f32 epilogue everywhere, incl. v5e).
    """
    output_dim, input_dim = weight.shape
    k_pad = _round_up(max(input_dim, 128), 128)
    n_pad = _round_up(max(output_dim, 128), 128)
    wt = jnp.zeros((k_pad, n_pad), compute_dtype)
    wt = wt.at[:input_dim, :output_dim].set(weight.T.astype(compute_dtype))
    b2 = jnp.zeros((1, n_pad), jnp.float32)
    b2 = b2.at[0, :output_dim].set(bias.astype(jnp.float32))
    return wt, b2


def _cap_block_m(block_m, k_pad, n_pad, w_bytes, budget_bytes=12 << 20):
    """Cap block_m so double-buffered x + double-buffered out + weight fit the
    default scoped VMEM limit on every TPU generation (incl. v7x)."""
    fixed = 2 * k_pad * n_pad * w_bytes + 2 * n_pad * 4 + (64 << 10)
    per_row = 2 * k_pad * 4 + 2 * n_pad * 4       # x (f32) + out (f32), 2-deep
    max_rows = max((budget_bytes - fixed) // per_row, 8)
    block_m = min(block_m, int(max_rows))
    return max((block_m // 8) * 8, 8)


def bert_intent_classifier(x, wt_padded, b_padded, output_dim, *, block_m=1024):
    """Forward pass equivalent to nn.Linear: x @ W^T + b.

    x:         (batch, input_dim) float32 (cast to weight dtype in-kernel)
    wt_padded: (k_pad, n_pad) pre-transposed, lane-padded weight
    b_padded:  (1, n_pad) float32 lane-padded bias
    returns    (batch, output_dim) float32
    """
    batch, input_dim = x.shape
    k_pad, n_pad = wt_padded.shape
    out_dtype = jnp.float32

    if input_dim != k_pad:
        # TODO(synk): upstream pooler should emit a 128-aligned feature dim;
        # this one-off pad only triggers for unaligned K (e.g. the toy demo).
        x = jnp.pad(x, ((0, 0), (0, k_pad - input_dim)))

    if batch <= block_m:
        # Tiny problem: one gridless invocation, everything resident in VMEM,
        # no pipeline machinery, no batch padding (Mosaic handles ragged rows).
        out = pl.pallas_call(
            _linear_kernel,
            out_shape=jax.ShapeDtypeStruct((batch, n_pad), out_dtype),
            in_specs=[
                pl.BlockSpec(memory_space=pltpu.MemorySpace.VMEM),
                pl.BlockSpec(memory_space=pltpu.MemorySpace.VMEM),
                pl.BlockSpec(memory_space=pltpu.MemorySpace.VMEM),
            ],
            out_specs=pl.BlockSpec(memory_space=pltpu.MemorySpace.VMEM),
        )(x, wt_padded, b_padded)
        return out[:, :output_dim]

    # Real-batch path: tile the batch axis only; full K and the full padded
    # output width stay resident.  No wrapper-side batch pad -- the grid is
    # cdiv(batch, block_m) and Pallas clips the ragged last block.
    w_bytes = jnp.dtype(wt_padded.dtype).itemsize
    block_m = _cap_block_m(block_m, k_pad, n_pad, w_bytes)
    grid_m = _cdiv(batch, block_m)
    if grid_m > 1 and grid_m % 2 == 1:
        # v7x megacore: keep the grid count even so the two TensorCores stay
        # balanced under dimension_semantics=("parallel",).
        grid_m += 1
        block_m = max(_round_up(_cdiv(batch, grid_m), 8), 8)
        grid_m = _cdiv(batch, block_m)

    out = pl.pallas_call(
        _linear_kernel,
        out_shape=jax.ShapeDtypeStruct((batch, n_pad), out_dtype),
        grid=(grid_m,),
        in_specs=[
            pl.BlockSpec((block_m, k_pad), lambda i: (i, 0)),
            # Constant block index -> fetched once by the pipeline.
            pl.BlockSpec((k_pad, n_pad), lambda i: (0, 0)),
            pl.BlockSpec((1, n_pad), lambda i: (0, 0)),
        ],
        out_specs=pl.BlockSpec((block_m, n_pad), lambda i: (i, 0)),
        compiler_params=pltpu.CompilerParams(
            dimension_semantics=("parallel",)),
    )(x, wt_padded, b_padded)

    return out[:, :output_dim]


if __name__ == "__main__":
    batch, input_dim, output_dim = 8, 32, 16

    key = jax.random.PRNGKey(0)
    kx, kw, kb, kx2 = jax.random.split(key, 4)

    # Deterministic synthetic parameters (mimic nn.Linear uniform init bound).
    bound = 1.0 / (input_dim ** 0.5)
    x = jax.random.normal(kx, (batch, input_dim), dtype=jnp.float32)
    weight = jax.random.uniform(kw, (output_dim, input_dim),
                                minval=-bound, maxval=bound, dtype=jnp.float32)
    bias = jax.random.uniform(kb, (output_dim,),
                              minval=-bound, maxval=bound, dtype=jnp.float32)

    ref = x @ weight.T + bias

    # --- f32 path, tiny batch -> gridless VMEM-resident call ---
    wt_f32, b_f32 = prepare_params(weight, bias, jnp.float32)
    out = jax.block_until_ready(
        bert_intent_classifier(x, wt_f32, b_f32, output_dim))
    assert out.shape == (batch, output_dim)
    assert jnp.allclose(out, ref, atol=1e-5, rtol=1e-5)

    # --- bf16 weights, f32 activations cast in-kernel, f32 accumulate ---
    wt_bf16, b_bf16 = prepare_params(weight, bias, jnp.bfloat16)
    out_bf16 = jax.block_until_ready(
        bert_intent_classifier(x, wt_bf16, b_bf16, output_dim))
    assert out_bf16.shape == (batch, output_dim)
    assert jnp.allclose(out_bf16, ref, atol=5e-2, rtol=5e-2)

    # --- larger, non-tile-multiple batch -> gridded path, ragged last block,
    #     even grid count (300 rows @ block_m=128 rebalances to 4 x 80) ---
    big_batch = 300
    xb = jax.random.normal(kx2, (big_batch, input_dim), dtype=jnp.float32)
    refb = xb @ weight.T + bias
    outb = jax.block_until_ready(
        bert_intent_classifier(xb, wt_f32, b_f32, output_dim, block_m=128))
    assert outb.shape == (big_batch, output_dim)
    assert jnp.allclose(outb, refb, atol=1e-5, rtol=1e-5)

    # --- gridded bf16-weight path ---
    outb_bf16 = jax.block_until_ready(
        bert_intent_classifier(xb, wt_bf16, b_bf16, output_dim, block_m=128))
    assert outb_bf16.shape == (big_batch, output_dim)
    assert jnp.allclose(outb_bf16, refb, atol=5e-2, rtol=5e-2)

    print("KERNEL_OK")
</pallas_src>

<mosaic_0001>
module attributes {stable_mosaic.version = 11 : i64} {
  func.func @_linear_kernel(%arg0: memref<8x128xf32, #tpu.memory_space<vmem>>, %arg1: memref<128x128xf32, #tpu.memory_space<vmem>>, %arg2: memref<1x128xf32, #tpu.memory_space<vmem>>, %arg3: memref<8x128xf32, #tpu.memory_space<vmem>>) attributes {dimension_semantics = [], scalar_prefetch = 0 : i64, scratch_operands = 0 : i64, tpu.core_type = #tpu.core_type<tc>} {
    %c0 = arith.constant 0 : index
    %c0_0 = arith.constant 0 : index
    %0 = vector.load %arg0[%c0, %c0_0] : memref<8x128xf32, #tpu.memory_space<vmem>>, vector<8x128xf32>
    %c0_1 = arith.constant 0 : index
    %c0_2 = arith.constant 0 : index
    %1 = vector.load %arg1[%c0_1, %c0_2] : memref<128x128xf32, #tpu.memory_space<vmem>>, vector<128x128xf32>
    %cst = arith.constant dense<0.000000e+00> : vector<8x128xf32>
    %2 = tpu.matmul %0, %1, %cst {dimension_numbers = #tpu.dot_dimension_numbers<[1], [0], [0], [1], [0, 0, 1, 1], [], []>} : vector<8x128xf32>, vector<128x128xf32>, vector<8x128xf32> -> vector<8x128xf32>
    %c0_3 = arith.constant 0 : index
    %c0_4 = arith.constant 0 : index
    %3 = vector.load %arg2[%c0_3, %c0_4] : memref<1x128xf32, #tpu.memory_space<vmem>>, vector<1x128xf32>
    %4 = vector.broadcast %3 : vector<1x128xf32> to vector<8x128xf32>
    %5 = arith.addf %2, %4 : vector<8x128xf32>
    %c0_5 = arith.constant 0 : index
    %c0_6 = arith.constant 0 : index
    %6 = vector.load %arg3[%c0_5, %c0_6] : memref<8x128xf32, #tpu.memory_space<vmem>>, vector<8x128xf32>
    tpu.vector_store %arg3[%c0_5, %c0_6], %5 {strides = array<i32>} : memref<8x128xf32, #tpu.memory_space<vmem>>, vector<8x128xf32>,
    return
  }
}

</mosaic_0001>

<bundles_post_ra>
// kernel: tpu_custom_call.1
= control target key start
LH: loop header
LB: loop body
LE: loop exit
PB: predicated region body
PF: predicated region fallthrough
CT: control target
= control target key end

     0   :  { %8 = vsyncpa [#allocation3], 0  ;;  %s317_s0 = inlined_call_operand.hbm [shape: f32[8,128], index: 0, kind: input, shape index: {}]   ;;  %s318_s1 = inlined_call_operand.hbm [shape: f32[128,128], index: 1, kind: input, shape index: {}]   ;;  %s319_s2 = inlined_call_operand.vmem [shape: f32[1,128], index: 2, kind: input, shape index: {}]   ;;  %s320_s3 = inlined_call_operand.hbm [shape: f32[8,128], index: 3, kind: output, shape index: {}]  }
   0x1   :  { %9 = vsyncpa [#allocation6], 0 }
   0x2   :  { %10 = vsyncpa [#allocation4], 0  ;;  %s278_s12 = smov [#allocation2]   ;;  %s279_s14 = smov [#allocation5]  }
   0x3   :  { %s17_s13 = sshll.u32 %s278_s12, 4  ;;  %s26_s15 = sshll.u32 %s279_s14, 4  ;;  %s18_s13 = int_to_ptr.vmem [resolvable:$true] %s17_s13  ;;  %s27_s15 = int_to_ptr.vmem [resolvable:$true] %s26_s15 }
   0x4   :  { %s220_s16 = scalar_lea.vmem %s18_s13, 128  ;;  %p225_p1 = scmp.lt.s32.totalorder %s18_s13, %s18_s13 }
   0x5   :  { %p221_p0 = scmp.ne.s32.totalorder %s18_s13, %s220_s16  ;;  %p226_p2 = scmp.lt.s32.totalorder %s220_s16, %s220_s16 }
   0x7   :  { %p227_p3 = por %p226_p2, %p225_p1 }
   0x9   :  { %p228_p4 = pnand %p227_p3, %p221_p0 }
   0xb   :  { %231 = shalt.err (!%p228_p4)
}
   0xc   :  { %20 = dma.hbm_to_vmem [thread:$0]  %s317_s0, 128, %s18_s13, [#allocation3]  }
   0xd   :  { %s240_s19 = scalar_lea.vmem %s27_s15, 2048  ;;  %p245_p6 = scmp.lt.s32.totalorder %s27_s15, %s27_s15 }
   0xe   :  { %p241_p5 = scmp.ne.s32.totalorder %s27_s15, %s240_s19  ;;  %p246_p7 = scmp.lt.s32.totalorder %s240_s19, %s240_s19 }
  0x10   :  { %p247_p8 = por %p246_p7, %p245_p6 }
  0x12   :  { %p248_p9 = pnand %p247_p8, %p241_p5 }
  0x14   :  { %251 = shalt.err (!%p248_p9)
}
  0x15   :  { %s280_s20 = smov 128   ;;  %s281_s21 = smov 8  }
  0x16   :  { %32 = dma.hbm_to_vmem [thread:$0]  %s318_s1, 2048, %s27_s15, [#allocation6], %s280_s20, %s280_s20, %s281_s21  }
  0x17   :  { %272 = dma.done.wait [#allocation3], 128  }
  0x18   :  { %273 = vsyncadd [#allocation3], 4294967168 }
  0x19   :  { %274 = dma.done.wait [#allocation6], 2048  }
  0x1a   :  { %275 = vsyncadd [#allocation6], 4294965248  ;;  %v282_v0 = vmov 0.0   ;;  %vm283_vm0 = vmmov 0   ;;  %v57_v1 = vld [vmem:[#allocation5 + $0x78] sm:$0xff]  ;;  %v56_v2 = vld [vmem:[#allocation5 + $0x70] sm:$0xff] }
  0x1b   :  { %170 = vmatprep.subr.mxu0 %v282_v0  ;;  %202 = vmatprep.mubr.msk.f32.mxu0 %vm283_vm0, %v282_v0  ;;  %v55_v3 = vld [vmem:[#allocation5 + $0x68] sm:$0xff]  ;;  %v54_v4 = vld [vmem:[#allocation5 + $0x60] sm:$0xff]  ;;  %v53_v5 = vld [vmem:[#allocation5 + $0x58] sm:$0xff]  ;;  %s284_s24 = smov [#allocation7]  }
  0x1c   :  { %171 = vmatpush3.msra.mxu0 %v57_v1  ;;  %v52_v6 = vld [vmem:[#allocation5 + $0x50] sm:$0xff]  ;;  %v51_v7 = vld [vmem:[#allocation5 + $0x48] sm:$0xff]  ;;  %v50_v8 = vld [vmem:[#allocation5 + $0x40] sm:$0xff]  ;;  %s142_s25 = sshll.u32 %s284_s24, 4  ;;  %s143_s25 = int_to_ptr.vmem [resolvable:$true] %s142_s25 }
  0x1d   :  { %172 = vmatprep.subr.mxu0 %v282_v0  ;;  %v49_v9 = vld [vmem:[#allocation5 + $0x38] sm:$0xff]  ;;  %v48_v10 = vld [vmem:[#allocation5 + $0x30] sm:$0xff]  ;;  %v47_v11 = vld [vmem:[#allocation5 + $0x28] sm:$0xff]  ;;  %s252_s26 = scalar_lea.vmem %s143_s25, 128  ;;  %p257_p11 = scmp.lt.s32.totalorder %s143_s25, %s143_s25 }
  0x1e   :  { %173 = vmatpush3.msra.mxu0 %v56_v2  ;;  %v46_v12 = vld [vmem:[#allocation5 + $0x20] sm:$0xff]  ;;  %v45_v13 = vld [vmem:[#allocation5 + $0x18] sm:$0xff]  ;;  %v44_v14 = vld [vmem:[#allocation5 + $0x10] sm:$0xff]  ;;  %p253_p10 = scmp.ne.s32.totalorder %s143_s25, %s252_s26  ;;  %p258_p12 = scmp.lt.s32.totalorder %s252_s26, %s252_s26 }
  0x1f   :  { %174 = vmatprep.subr.mxu0 %v282_v0  ;;  %v43_v15 = vld [vmem:[#allocation5 + $0x8] sm:$0xff]  ;;  %v42_v16 = vld [vmem:[#allocation5] sm:$0xff]  ;;  %v41_v17 = vld [vmem:[#allocation2] sm:$0xff] }
  0x20   :  { %175 = vmatpush3.msra.mxu0 %v55_v3  ;;  %v152_v18 = vld [vmem:[%s319_s2] ss:$0 sm:$0xff]  ;;  %p259_p13 = por %p258_p12, %p257_p11 }
  0x21   :  { %176 = vmatprep.subr.mxu0 %v282_v0 }
  0x22   :  { %177 = vmatpush3.msra.mxu0 %v54_v4  ;;  %p260_p0 = pnand %p259_p13, %p253_p10 }
  0x23   :  { %178 = vmatprep.subr.mxu0 %v282_v0 }
  0x24   :  { %179 = vmatpush3.msra.mxu0 %v53_v5 }
  0x25   :  { %180 = vmatprep.subr.mxu0 %v282_v0 }
  0x26   :  { %181 = vmatpush3.msra.mxu0 %v52_v6 }
  0x27   :  { %182 = vmatprep.subr.mxu0 %v282_v0 }
  0x28   :  { %183 = vmatpush3.msra.mxu0 %v51_v7 }
  0x29   :  { %184 = vmatprep.subr.mxu0 %v282_v0 }
  0x2a   :  { %185 = vmatpush3.msra.mxu0 %v50_v8 }
  0x2b   :  { %186 = vmatprep.subr.mxu0 %v282_v0 }
  0x2c   :  { %187 = vmatpush3.msra.mxu0 %v49_v9 }
  0x2d   :  { %188 = vmatprep.subr.mxu0 %v282_v0 }
  0x2e   :  { %189 = vmatpush3.msra.mxu0 %v48_v10 }
  0x2f   :  { %190 = vmatprep.subr.mxu0 %v282_v0 }
  0x30   :  { %191 = vmatpush3.msra.mxu0 %v47_v11 }
  0x31   :  { %192 = vmatprep.subr.mxu0 %v282_v0 }
  0x32   :  { %193 = vmatpush3.msra.mxu0 %v46_v12 }
  0x33   :  { %194 = vmatprep.subr.mxu0 %v282_v0 }
  0x34   :  { %195 = vmatpush3.msra.mxu0 %v45_v13 }
  0x35   :  { %196 = vmatprep.subr.mxu0 %v282_v0 }
  0x36   :  { %197 = vmatpush3.msra.mxu0 %v44_v14 }
  0x37   :  { %198 = vmatprep.subr.mxu0 %v282_v0 }
  0x38   :  { %199 = vmatpush3.msra.mxu0 %v43_v15 }
  0x39   :  { %200 = vmatprep.subr.mxu0 %v282_v0 }
  0x3a   :  { %201 = vmatpush3.msra.mxu0 %v42_v16 }
  0x3b   :  { %203 = vmatmul.mubr.f32.vlgmr.msra.gmra.mxu0 %v41_v17 }
  0xfb   :  { %v131_v19 = vpop.f32.mrf.mxu0 }
  0xfc   :  { %v132_v20 = vadd.f32 %v152_v18, %v131_v19 }
  0xfd   :  { %v204_v21 = vpop.f32.mrf.mxu0 }
  0xfe   :  { %135 = vst [vmem:[#allocation7] sm:$0xff] %v132_v20 }
  0xff   :  { %263 = shalt.err (!%p260_p0)
}
 0x100   :  { %145 = dma.vmem_to_hbm [thread:$0]  %s143_s25, 128, %s320_s3, [#allocation4]  }
 0x101   :  { %276 = dma.done.wait [#allocation4], 128  }
 0x102   :  { %277 = vsyncadd [#allocation4], 4294967168 }
 0x103   :  { %149 = vsyncpa [#allocation3], 1 }
 0x104   :  { %150 = vsyncpa [#allocation6], 1 }
 0x105   :  { %151 = vsyncpa [#allocation4], 1 }

</bundles_post_ra>
